<compile_context>
chip_gen: v7x
topology: tpu7x:2x2x1
jax: 0.10.0
libtpu: 0.0.40
codegen_flags: <defaults>
</compile_context>

<pallas_src>
import functools
import math

import jax
import jax.numpy as jnp
from jax import lax
from jax.experimental import pallas as pl
from jax.experimental.pallas import tpu as pltpu


def _round_up(x: int, m: int) -> int:
    return ((x + m - 1) // m) * m


def _nbytes(a) -> int:
    return int(a.size) * jnp.dtype(a.dtype).itemsize


# ----------------------------------------------------------------------------- kernels
def _linear_kernel(x_ref, w_ref, b_ref, o_ref):
    """Single Linear layer (num_hidden_layers == 0): out = x @ W + b."""
    y = jnp.dot(x_ref[...].astype(w_ref.dtype), w_ref[...],
                preferred_element_type=jnp.float32)
    o_ref[...] = (y + b_ref[...]).astype(o_ref.dtype)


def _mlp_resident_kernel(x_ref, wf_ref, bf_ref, wh_ref, bh_ref, wl_ref, bl_ref,
                         o_ref, act_ref, *, n_h2h: int):
    """Whole MLP in ONE grid step: all weights resident in VMEM, the f32 activation
    lives in a VMEM scratch, layers are iterated in-kernel."""
    # First layer: input -> hidden, ReLU (f32 epilogue).
    a0 = jnp.dot(x_ref[...].astype(wf_ref.dtype), wf_ref[...],
                 preferred_element_type=jnp.float32)
    act_ref[...] = jnp.maximum(a0 + bf_ref[...], 0.0)

    # hidden -> hidden layers.
    def layer(i):
        h = jnp.dot(act_ref[...].astype(wh_ref.dtype), wh_ref[i],
                    preferred_element_type=jnp.float32)
        act_ref[...] = jnp.maximum(h + bh_ref[i], 0.0)

    if n_h2h <= 16:
        # Short nets: static unroll (full scheduler visibility).
        for i in range(n_h2h):
            layer(i)
    else:
        # Deep nets: rolled loop with a dynamic layer index into the resident stack.
        def body(i, carry):
            layer(i)
            return carry
        lax.fori_loop(0, n_h2h, body, 0)

    # Final projection: hidden -> output, no activation; lane-dense f32 store.
    y = jnp.dot(act_ref[...].astype(wl_ref.dtype), wl_ref[...],
                preferred_element_type=jnp.float32)
    o_ref[...] = (y + bl_ref[...]).astype(o_ref.dtype)


def _mlp_streamed_kernel(x_ref, wf_ref, bf_ref, wh_ref, bh_ref, wl_ref, bl_ref,
                         o_ref, act_ref, *, n_h2h: int):
    """Fallback for weight stacks too large to keep resident: the grid iterates over
    hidden->hidden layers; Pallas double-buffers each (Dh, Dh) weight block so layer
    l+1's weight DMA overlaps layer l's MXU work.  First/last projections and the
    activation stay resident across the grid."""
    l = pl.program_id(0)
    last = pl.num_programs(0) - 1

    @pl.when(l == 0)
    def _():
        a0 = jnp.dot(x_ref[...].astype(wf_ref.dtype), wf_ref[...],
                     preferred_element_type=jnp.float32)
        act_ref[...] = jnp.maximum(a0 + bf_ref[...], 0.0)

    @pl.when(l < n_h2h)
    def _():
        h = jnp.dot(act_ref[...].astype(wh_ref.dtype), wh_ref[...],
                    preferred_element_type=jnp.float32)
        act_ref[...] = jnp.maximum(h + bh_ref[...], 0.0)

    @pl.when(l == last)
    def _():
        y = jnp.dot(act_ref[...].astype(wl_ref.dtype), wl_ref[...],
                    preferred_element_type=jnp.float32)
        o_ref[...] = (y + bl_ref[...]).astype(o_ref.dtype)


# -------------------------------------------------------------------------- parameters
def init_dynamic_nn_params(key, input_dim, num_hidden_layers, hidden_dimension,
                           output_dimension, dtype=jnp.float32):
    """nn.Linear-style init (uniform +-1/sqrt(fan_in)); weights stored pre-transposed
    as (d_in, d_out) so the kernel computes x @ W + b."""
    dims = [input_dim] + [hidden_dimension] * num_hidden_layers + [output_dimension]
    params = []
    for i in range(len(dims) - 1):
        d_in, d_out = dims[i], dims[i + 1]
        key, wk, bk = jax.random.split(key, 3)
        bound = 1.0 / math.sqrt(d_in)
        w = jax.random.uniform(wk, (d_in, d_out), dtype, minval=-bound, maxval=bound)
        b = jax.random.uniform(bk, (1, d_out), dtype, minval=-bound, maxval=bound)
        params.append((w, b))
    return params


def pack_dynamic_nn_params(params, weights_dtype=jnp.bfloat16):
    """Split layers into first / hidden-stack / last, each zero-padded to its own
    128-lane multiple.  Weights stored in `weights_dtype` (bf16 default), biases f32."""
    num_layers = len(params)
    d_in = int(params[0][0].shape[0])
    d_out = int(params[-1][0].shape[1])
    din_p, dout_p = _round_up(d_in, 128), _round_up(d_out, 128)

    if num_layers == 1:  # num_hidden_layers == 0: a single Linear
        w, b = params[0]
        w_p = jnp.zeros((din_p, dout_p), weights_dtype).at[:d_in, :d_out].set(
            w.astype(weights_dtype))
        b_p = jnp.zeros((1, dout_p), jnp.float32).at[:, :d_out].set(
            b.reshape(1, -1).astype(jnp.float32))
        meta = dict(num_layers=1, d_in=d_in, d_out=d_out, din_p=din_p,
                    dout_p=dout_p, d_h=0, dh_p=0, n_h2h=0)
        return dict(w_last=w_p, b_last=b_p), meta

    d_h = int(params[0][0].shape[1])
    dh_p = _round_up(d_h, 128)
    n_h2h = num_layers - 2            # hidden -> hidden layers
    n_alloc = max(n_h2h, 1)           # keep stacks non-empty

    w0, b0 = params[0]
    w_first = jnp.zeros((din_p, dh_p), weights_dtype).at[:d_in, :d_h].set(
        w0.astype(weights_dtype))
    b_first = jnp.zeros((1, dh_p), jnp.float32).at[:, :d_h].set(
        b0.reshape(1, -1).astype(jnp.float32))

    w_hidden = jnp.zeros((n_alloc, dh_p, dh_p), weights_dtype)
    b_hidden = jnp.zeros((n_alloc, 1, dh_p), jnp.float32)
    for i in range(n_h2h):
        w, b = params[1 + i]
        w_hidden = w_hidden.at[i, :d_h, :d_h].set(w.astype(weights_dtype))
        b_hidden = b_hidden.at[i, :, :d_h].set(b.reshape(1, -1).astype(jnp.float32))

    wl, bl = params[-1]
    w_last = jnp.zeros((dh_p, dout_p), weights_dtype).at[:d_h, :d_out].set(
        wl.astype(weights_dtype))
    b_last = jnp.zeros((1, dout_p), jnp.float32).at[:, :d_out].set(
        bl.reshape(1, -1).astype(jnp.float32))

    packed = dict(w_first=w_first, b_first=b_first, w_hidden=w_hidden,
                  b_hidden=b_hidden, w_last=w_last, b_last=b_last)
    meta = dict(num_layers=num_layers, d_in=d_in, d_out=d_out, d_h=d_h,
                din_p=din_p, dh_p=dh_p, dout_p=dout_p, n_h2h=n_h2h)
    return packed, meta


# ------------------------------------------------------------------------------ forward
def _vmem_limit_bytes(est_bytes: int) -> int:
    # v5e/v6e have 128 MiB physical VMEM, v7x only 64 MiB: take 75% of the actual
    # chip's capacity, falling back to a generation-safe 48 MiB.
    try:
        cap = int(pltpu.get_tpu_info().vmem_capacity_bytes) * 3 // 4
    except Exception:
        cap = 48 << 20
    return int(min(max(2 * est_bytes, 4 << 20), cap))


def dynamic_nn_forward(x, packed, meta):
    """Fused forward pass: one pallas_call for the whole network."""
    B = int(x.shape[0])
    B_pad = max(8, _round_up(B, 8))
    din_p, dout_p = meta["din_p"], meta["dout_p"]
    f32b = 4

    # Zero-pad the input to (B_pad, din_p); padded rows/cols stay zero through the net.
    x_pad = jnp.zeros((B_pad, din_p), jnp.float32).at[:B, :meta["d_in"]].set(
        x.astype(jnp.float32))

    if meta["num_layers"] == 1:
        w, b = packed["w_last"], packed["b_last"]
        est = _nbytes(x_pad) + _nbytes(w) + _nbytes(b) + B_pad * dout_p * f32b
        out_pad = pl.pallas_call(
            _linear_kernel,
            out_shape=jax.ShapeDtypeStruct((B_pad, dout_p), jnp.float32),
            grid_spec=pltpu.PrefetchScalarGridSpec(
                num_scalar_prefetch=0,
                grid=(1,),
                in_specs=[pl.BlockSpec((B_pad, din_p), lambda l: (0, 0)),
                          pl.BlockSpec((din_p, dout_p), lambda l: (0, 0)),
                          pl.BlockSpec((1, dout_p), lambda l: (0, 0))],
                out_specs=pl.BlockSpec((B_pad, dout_p), lambda l: (0, 0)),
            ),
            compiler_params=pltpu.CompilerParams(
                dimension_semantics=("arbitrary",),
                vmem_limit_bytes=_vmem_limit_bytes(est)),
        )(x_pad, w, b)
        return out_pad[:B, :meta["d_out"]]

    dh_p, n_h2h = meta["dh_p"], meta["n_h2h"]
    w_first, b_first = packed["w_first"], packed["b_first"]
    w_hidden, b_hidden = packed["w_hidden"], packed["b_hidden"]
    w_last, b_last = packed["w_last"], packed["b_last"]

    io_bytes = (_nbytes(x_pad)                       # resident input block
                + B_pad * dout_p * f32b              # resident output block
                + B_pad * dh_p * f32b)               # f32 activation scratch
    edge_bytes = (_nbytes(w_first) + _nbytes(b_first)
                  + _nbytes(w_last) + _nbytes(b_last))
    hidden_bytes = _nbytes(w_hidden) + _nbytes(b_hidden)
    per_layer_bytes = (dh_p * dh_p * jnp.dtype(w_hidden.dtype).itemsize
                       + dh_p * f32b)

    # Small nets: keep ALL weights resident and run every layer in a single grid step.
    # Large nets: stream the hidden stack one (double-buffered) layer block per step.
    resident = (edge_bytes + hidden_bytes + io_bytes) <= (16 << 20)

    if resident:
        est = edge_bytes + hidden_bytes + io_bytes
        kernel = functools.partial(_mlp_resident_kernel, n_h2h=n_h2h)
        grid = (1,)
        w_hidden_spec = pl.BlockSpec(w_hidden.shape, lambda l: (0, 0, 0))
        b_hidden_spec = pl.BlockSpec(b_hidden.shape, lambda l: (0, 0, 0))
    else:
        est = edge_bytes + 2 * per_layer_bytes + io_bytes
        kernel = functools.partial(_mlp_streamed_kernel, n_h2h=n_h2h)
        grid = (max(n_h2h, 1),)
        w_hidden_spec = pl.BlockSpec((None, dh_p, dh_p), lambda l: (l, 0, 0))
        b_hidden_spec = pl.BlockSpec((None, 1, dh_p), lambda l: (l, 0, 0))

    out_pad = pl.pallas_call(
        kernel,
        out_shape=jax.ShapeDtypeStruct((B_pad, dout_p), jnp.float32),
        grid_spec=pltpu.PrefetchScalarGridSpec(
            num_scalar_prefetch=0,
            grid=grid,
            in_specs=[
                pl.BlockSpec((B_pad, din_p), lambda l: (0, 0)),   # x, resident
                pl.BlockSpec((din_p, dh_p), lambda l: (0, 0)),    # first projection
                pl.BlockSpec((1, dh_p), lambda l: (0, 0)),
                w_hidden_spec,                                    # hidden stack / block
                b_hidden_spec,
                pl.BlockSpec((dh_p, dout_p), lambda l: (0, 0)),   # last projection
                pl.BlockSpec((1, dout_p), lambda l: (0, 0)),
            ],
            out_specs=pl.BlockSpec((B_pad, dout_p), lambda l: (0, 0)),
            scratch_shapes=[pltpu.VMEM((B_pad, dh_p), jnp.float32)],
        ),
        compiler_params=pltpu.CompilerParams(
            dimension_semantics=("arbitrary",),   # layer axis is sequential
            vmem_limit_bytes=_vmem_limit_bytes(est),
        ),
    )(x_pad, w_first, b_first, w_hidden, b_hidden, w_last, b_last)

    return out_pad[:B, :meta["d_out"]]


# ---------------------------------------------------------------------------- reference
def dynamic_nn_forward_ref(x, params, compute_dtype=jnp.float32):
    """Pure-JAX reference.  With compute_dtype=bf16 it mimics the kernel's dtype
    discipline (bf16 matmul inputs, f32 accumulation / bias / ReLU)."""
    n = len(params)
    h = x.astype(jnp.float32)
    for i, (w, b) in enumerate(params):
        lhs = h.astype(compute_dtype).astype(jnp.float32)
        rhs = w.astype(compute_dtype).astype(jnp.float32)
        h = jnp.dot(lhs, rhs, preferred_element_type=jnp.float32) \
            + b.reshape(1, -1).astype(jnp.float32)
        if i < n - 1:
            h = jnp.maximum(h, 0.0)
    return h


if __name__ == "__main__":
    # Small shapes consistent with the module signature.
    batch = 8
    input_dim = 32
    num_hidden_layers = 2
    hidden_dimension = 64
    output_dimension = 16

    key = jax.random.PRNGKey(0)
    key, xk = jax.random.split(key)
    x = jax.random.normal(xk, (batch, input_dim), dtype=jnp.float32)

    params = init_dynamic_nn_params(
        key, input_dim, num_hidden_layers, hidden_dimension, output_dimension)
    packed, meta = pack_dynamic_nn_params(params, weights_dtype=jnp.bfloat16)

    out = dynamic_nn_forward(x, packed, meta)
    out = jax.block_until_ready(out)

    assert out.shape == (batch, output_dimension)

    # Exact-dtype reference (bf16 matmul inputs, f32 accumulation, like the kernel).
    ref_bf16 = dynamic_nn_forward_ref(x, params, compute_dtype=jnp.bfloat16)
    err_bf16 = float(jnp.max(jnp.abs(out - ref_bf16)))
    assert jnp.allclose(out, ref_bf16, atol=1e-3, rtol=1e-3), err_bf16

    # Full-f32 module semantics within bf16-weight tolerance.
    ref_f32 = dynamic_nn_forward_ref(x, params, compute_dtype=jnp.float32)
    err_f32 = float(jnp.max(jnp.abs(out - ref_f32)))
    assert jnp.allclose(out, ref_f32, atol=5e-2, rtol=5e-2), err_f32

    print("KERNEL_OK")
</pallas_src>

<mosaic_0001>
module attributes {stable_mosaic.version = 11 : i64} {
  func.func @_mlp_resident_kernel(%arg0: i32, %arg1: memref<8x128xf32, #tpu.memory_space<vmem>>, %arg2: memref<128x128xbf16, #tpu.memory_space<vmem>>, %arg3: memref<1x128xf32, #tpu.memory_space<vmem>>, %arg4: memref<1x128x128xbf16, #tpu.memory_space<vmem>>, %arg5: memref<1x1x128xf32, #tpu.memory_space<vmem>>, %arg6: memref<128x128xbf16, #tpu.memory_space<vmem>>, %arg7: memref<1x128xf32, #tpu.memory_space<vmem>>, %arg8: memref<8x128xf32, #tpu.memory_space<vmem>>, %arg9: memref<8x128xf32, #tpu.memory_space<vmem>>) attributes {dimension_semantics = [#tpu.dimension_semantics<arbitrary>], iteration_bounds = array<i64: 1>, scalar_prefetch = 0 : i64, scratch_operands = 1 : i64, tpu.core_type = #tpu.core_type<tc>, window_params = [{pipeline_mode = #tpu.pipeline_mode<synchronous>, transform_indices = @transform_0, window_bounds = array<i64: 8, 128>}, {pipeline_mode = #tpu.pipeline_mode<synchronous>, transform_indices = @transform_1, window_bounds = array<i64: 128, 128>}, {pipeline_mode = #tpu.pipeline_mode<synchronous>, transform_indices = @transform_2, window_bounds = array<i64: 1, 128>}, {pipeline_mode = #tpu.pipeline_mode<synchronous>, transform_indices = @transform_3, window_bounds = array<i64: 1, 128, 128>}, {pipeline_mode = #tpu.pipeline_mode<synchronous>, transform_indices = @transform_4, window_bounds = array<i64: 1, 1, 128>}, {pipeline_mode = #tpu.pipeline_mode<synchronous>, transform_indices = @transform_5, window_bounds = array<i64: 128, 128>}, {pipeline_mode = #tpu.pipeline_mode<synchronous>, transform_indices = @transform_6, window_bounds = array<i64: 1, 128>}, {pipeline_mode = #tpu.pipeline_mode<synchronous>, transform_indices = @transform_7, window_bounds = array<i64: 8, 128>}]} {
    %c0 = arith.constant 0 : index
    %c0_0 = arith.constant 0 : index
    %0 = vector.load %arg1[%c0, %c0_0] : memref<8x128xf32, #tpu.memory_space<vmem>>, vector<8x128xf32>
    %1 = arith.truncf %0 : vector<8x128xf32> to vector<8x128xbf16>
    %c0_1 = arith.constant 0 : index
    %c0_2 = arith.constant 0 : index
    %2 = vector.load %arg2[%c0_1, %c0_2] : memref<128x128xbf16, #tpu.memory_space<vmem>>, vector<128x128xbf16>
    %cst = arith.constant dense<0.000000e+00> : vector<8x128xf32>
    %3 = tpu.matmul %1, %2, %cst {dimension_numbers = #tpu.dot_dimension_numbers<[1], [0], [0], [1], [0, 0, 1, 1], [], []>} : vector<8x128xbf16>, vector<128x128xbf16>, vector<8x128xf32> -> vector<8x128xf32>
    %c0_3 = arith.constant 0 : index
    %c0_4 = arith.constant 0 : index
    %4 = vector.load %arg3[%c0_3, %c0_4] : memref<1x128xf32, #tpu.memory_space<vmem>>, vector<1x128xf32>
    %5 = vector.broadcast %4 : vector<1x128xf32> to vector<8x128xf32>
    %6 = arith.addf %3, %5 : vector<8x128xf32>
    %cst_5 = arith.constant 0.000000e+00 : f32
    %7 = vector.broadcast %cst_5 : f32 to vector<8x128xf32>
    %8 = arith.maximumf %6, %7 : vector<8x128xf32>
    %c0_6 = arith.constant 0 : index
    %c0_7 = arith.constant 0 : index
    %9 = vector.load %arg9[%c0_6, %c0_7] : memref<8x128xf32, #tpu.memory_space<vmem>>, vector<8x128xf32>
    tpu.vector_store %arg9[%c0_6, %c0_7], %8 {strides = array<i32>} : memref<8x128xf32, #tpu.memory_space<vmem>>, vector<8x128xf32>,
    %c0_8 = arith.constant 0 : index
    %c0_9 = arith.constant 0 : index
    %10 = vector.load %arg9[%c0_8, %c0_9] : memref<8x128xf32, #tpu.memory_space<vmem>>, vector<8x128xf32>
    %11 = arith.truncf %10 : vector<8x128xf32> to vector<8x128xbf16>
    %c0_10 = arith.constant 0 : index
    %c0_11 = arith.constant 0 : index
    %c0_12 = arith.constant 0 : index
    %12 = vector.load %arg4[%c0_10, %c0_11, %c0_12] : memref<1x128x128xbf16, #tpu.memory_space<vmem>>, vector<1x128x128xbf16>
    %13 = vector.shape_cast %12 : vector<1x128x128xbf16> to vector<128x128xbf16>
    %cst_13 = arith.constant dense<0.000000e+00> : vector<8x128xf32>
    %14 = tpu.matmul %11, %13, %cst_13 {dimension_numbers = #tpu.dot_dimension_numbers<[1], [0], [0], [1], [0, 0, 1, 1], [], []>} : vector<8x128xbf16>, vector<128x128xbf16>, vector<8x128xf32> -> vector<8x128xf32>
    %c0_14 = arith.constant 0 : index
    %c0_15 = arith.constant 0 : index
    %c0_16 = arith.constant 0 : index
    %15 = vector.load %arg5[%c0_14, %c0_15, %c0_16] : memref<1x1x128xf32, #tpu.memory_space<vmem>>, vector<1x1x128xf32>
    %16 = vector.shape_cast %15 : vector<1x1x128xf32> to vector<1x128xf32>
    %17 = vector.broadcast %16 : vector<1x128xf32> to vector<8x128xf32>
    %18 = arith.addf %14, %17 : vector<8x128xf32>
    %cst_17 = arith.constant 0.000000e+00 : f32
    %19 = vector.broadcast %cst_17 : f32 to vector<8x128xf32>
    %20 = arith.maximumf %18, %19 : vector<8x128xf32>
    %c0_18 = arith.constant 0 : index
    %c0_19 = arith.constant 0 : index
    %21 = vector.load %arg9[%c0_18, %c0_19] : memref<8x128xf32, #tpu.memory_space<vmem>>, vector<8x128xf32>
    tpu.vector_store %arg9[%c0_18, %c0_19], %20 {strides = array<i32>} : memref<8x128xf32, #tpu.memory_space<vmem>>, vector<8x128xf32>,
    %c0_20 = arith.constant 0 : index
    %c0_21 = arith.constant 0 : index
    %22 = vector.load %arg9[%c0_20, %c0_21] : memref<8x128xf32, #tpu.memory_space<vmem>>, vector<8x128xf32>
    %23 = arith.truncf %22 : vector<8x128xf32> to vector<8x128xbf16>
    %c0_22 = arith.constant 0 : index
    %c0_23 = arith.constant 0 : index
    %24 = vector.load %arg6[%c0_22, %c0_23] : memref<128x128xbf16, #tpu.memory_space<vmem>>, vector<128x128xbf16>
    %cst_24 = arith.constant dense<0.000000e+00> : vector<8x128xf32>
    %25 = tpu.matmul %23, %24, %cst_24 {dimension_numbers = #tpu.dot_dimension_numbers<[1], [0], [0], [1], [0, 0, 1, 1], [], []>} : vector<8x128xbf16>, vector<128x128xbf16>, vector<8x128xf32> -> vector<8x128xf32>
    %c0_25 = arith.constant 0 : index
    %c0_26 = arith.constant 0 : index
    %26 = vector.load %arg7[%c0_25, %c0_26] : memref<1x128xf32, #tpu.memory_space<vmem>>, vector<1x128xf32>
    %27 = vector.broadcast %26 : vector<1x128xf32> to vector<8x128xf32>
    %28 = arith.addf %25, %27 : vector<8x128xf32>
    %c0_27 = arith.constant 0 : index
    %c0_28 = arith.constant 0 : index
    %29 = vector.load %arg8[%c0_27, %c0_28] : memref<8x128xf32, #tpu.memory_space<vmem>>, vector<8x128xf32>
    tpu.vector_store %arg8[%c0_27, %c0_28], %28 {strides = array<i32>} : memref<8x128xf32, #tpu.memory_space<vmem>>, vector<8x128xf32>,
    return
  }
  func.func @transform_0(%arg0: i32) -> (i32, i32) {
    %c0_i32 = arith.constant 0 : i32
    %c0_i32_0 = arith.constant 0 : i32
    %c0_i32_1 = arith.constant 0 : i32
    return %c0_i32, %c0_i32_0 : i32, i32
  }
  func.func @transform_1(%arg0: i32) -> (i32, i32) {
    %c0_i32 = arith.constant 0 : i32
    %c0_i32_0 = arith.constant 0 : i32
    %c0_i32_1 = arith.constant 0 : i32
    return %c0_i32, %c0_i32_0 : i32, i32
  }
  func.func @transform_2(%arg0: i32) -> (i32, i32) {
    %c0_i32 = arith.constant 0 : i32
    %c0_i32_0 = arith.constant 0 : i32
    %c0_i32_1 = arith.constant 0 : i32
    return %c0_i32, %c0_i32_0 : i32, i32
  }
  func.func @transform_3(%arg0: i32) -> (i32, i32, i32) {
    %c0_i32 = arith.constant 0 : i32
    %c0_i32_0 = arith.constant 0 : i32
    %c0_i32_1 = arith.constant 0 : i32
    %c0_i32_2 = arith.constant 0 : i32
    return %c0_i32, %c0_i32_0, %c0_i32_1 : i32, i32, i32
  }
  func.func @transform_4(%arg0: i32) -> (i32, i32, i32) {
    %c0_i32 = arith.constant 0 : i32
    %c0_i32_0 = arith.constant 0 : i32
    %c0_i32_1 = arith.constant 0 : i32
    %c0_i32_2 = arith.constant 0 : i32
    return %c0_i32, %c0_i32_0, %c0_i32_1 : i32, i32, i32
  }
  func.func @transform_5(%arg0: i32) -> (i32, i32) {
    %c0_i32 = arith.constant 0 : i32
    %c0_i32_0 = arith.constant 0 : i32
    %c0_i32_1 = arith.constant 0 : i32
    return %c0_i32, %c0_i32_0 : i32, i32
  }
  func.func @transform_6(%arg0: i32) -> (i32, i32) {
    %c0_i32 = arith.constant 0 : i32
    %c0_i32_0 = arith.constant 0 : i32
    %c0_i32_1 = arith.constant 0 : i32
    return %c0_i32, %c0_i32_0 : i32, i32
  }
  func.func @transform_7(%arg0: i32) -> (i32, i32) {
    %c0_i32 = arith.constant 0 : i32
    %c0_i32_0 = arith.constant 0 : i32
    %c0_i32_1 = arith.constant 0 : i32
    return %c0_i32, %c0_i32_0 : i32, i32
  }
}

</mosaic_0001>

<bundles_post_ra>
// kernel: tpu_custom_call.1
= control target key start
LH: loop header
LB: loop body
LE: loop exit
PB: predicated region body
PF: predicated region fallthrough
CT: control target
= control target key end

     0   :  { %12 = vsyncpa [#allocation4], 0  ;;  %s864_s0 = inlined_call_operand.hbm [shape: f32[8,128], index: 0, kind: input, shape index: {}]   ;;  %s865_s1 = inlined_call_operand.hbm [shape: bf16[128,128], index: 1, kind: input, shape index: {}]   ;;  %s866_s2 = inlined_call_operand.vmem [shape: f32[1,128], index: 2, kind: input, shape index: {}]   ;;  %s867_s3 = inlined_call_operand.hbm [shape: bf16[1,128,128], index: 3, kind: input, shape index: {}]   ;;  %s868_s4 = inlined_call_operand.vmem [shape: f32[1,1,128], index: 4, kind: input, shape index: {}]   ;;  %s869_s5 = inlined_call_operand.hbm [shape: bf16[128,128], index: 5, kind: input, shape index: {}]   ;;  %s870_s6 = inlined_call_operand.vmem [shape: f32[1,128], index: 6, kind: input, shape index: {}]   ;;  %s871_s7 = inlined_call_operand.hbm [shape: f32[8,128], index: 7, kind: output, shape index: {}]  }
   0x1   :  { %13 = vsyncpa [#allocation7], 0 }
   0x2   :  { %14 = vsyncpa [#allocation10], 0 }
   0x3   :  { %15 = vsyncpa [#allocation5], 0  ;;  %s707_s24 = smov [#allocation6]   ;;  %s589_s28 = scalar_lea.hbm %s865_s1, 1024 }
   0x4   :  { %s31_s25 = sshll.u32 %s707_s24, 4  ;;  %p590_p0 = scmp.ne.s32.totalorder %s865_s1, %s589_s28  ;;  %s32_s25 = int_to_ptr.vmem [resolvable:$true] %s31_s25 }
   0x5   :  { %p593_p1 = scmp.lt.u32.totalorder %s589_s28, %s865_s1 }
   0x7   :  { %p595_p2 = pnand %p593_p1, %p590_p0 }
   0x9   :  { %598 = shalt.err (!%p595_p2)
}
   0xa   :  { %s599_s10 = scalar_lea.vmem %s32_s25, 1024  ;;  %p604_p4 = scmp.lt.s32.totalorder %s32_s25, %s32_s25 }
   0xb   :  { %p600_p3 = scmp.ne.s32.totalorder %s32_s25, %s599_s10  ;;  %p605_p5 = scmp.lt.s32.totalorder %s599_s10, %s599_s10 }
   0xd   :  { %p606_p6 = por %p605_p5, %p604_p4 }
   0xf   :  { %p607_p7 = pnand %p606_p6, %p600_p3 }
  0x11   :  { %610 = shalt.err (!%p607_p7)
}
  0x12   :  { %s708_s11 = smov 64   ;;  %s709_s12 = smov 4  }
  0x13   :  { %37 = dma.hbm_to_vmem [thread:$0]  %s865_s1, 1024, %s32_s25, [#allocation7], %s708_s11, %s708_s11, %s709_s12  }
  0x14   :  { %s710_s15 = smov [#allocation3]   ;;  %s711_s17 = smov [#allocation8]  }
  0x15   :  { %s22_s16 = sshll.u32 %s710_s15, 4  ;;  %s45_s18 = sshll.u32 %s711_s17, 4  ;;  %s23_s16 = int_to_ptr.vmem [resolvable:$true] %s22_s16  ;;  %s46_s18 = int_to_ptr.vmem [resolvable:$true] %s45_s18 }
  0x16   :  { %s611_s21 = scalar_lea.hbm %s864_s0, 128 }
  0x17   :  { %p612_p8 = scmp.ne.s32.totalorder %s864_s0, %s611_s21  ;;  %p615_p9 = scmp.lt.u32.totalorder %s611_s21, %s864_s0 }
  0x19   :  { %p617_p10 = pnand %p615_p9, %p612_p8 }
  0x1b   :  { %620 = shalt.err (!%p617_p10)
}
  0x1c   :  { %s621_s1 = scalar_lea.vmem %s23_s16, 128  ;;  %p626_p12 = scmp.lt.s32.totalorder %s23_s16, %s23_s16 }
  0x1d   :  { %p622_p11 = scmp.ne.s32.totalorder %s23_s16, %s621_s1  ;;  %p627_p13 = scmp.lt.s32.totalorder %s621_s1, %s621_s1 }
  0x1f   :  { %p628_p0 = por %p627_p13, %p626_p12 }
  0x21   :  { %p629_p1 = pnand %p628_p0, %p622_p11 }
  0x23   :  { %632 = shalt.err (!%p629_p1)
}
  0x24   :  { %25 = dma.hbm_to_vmem [thread:$0]  %s864_s0, 128, %s23_s16, [#allocation4]  }
  0x25   :  { %s633_s30 = scalar_lea.hbm %s867_s3, 1024 }
  0x26   :  { %p634_p2 = scmp.ne.s32.totalorder %s867_s3, %s633_s30  ;;  %p637_p3 = scmp.lt.u32.totalorder %s633_s30, %s867_s3 }
  0x28   :  { %p639_p4 = pnand %p637_p3, %p634_p2 }
  0x2a   :  { %642 = shalt.err (!%p639_p4)
}
  0x2b   :  { %s643_s14 = scalar_lea.vmem %s46_s18, 1024  ;;  %p648_p6 = scmp.lt.s32.totalorder %s46_s18, %s46_s18 }
  0x2c   :  { %p644_p5 = scmp.ne.s32.totalorder %s46_s18, %s643_s14  ;;  %p649_p7 = scmp.lt.s32.totalorder %s643_s14, %s643_s14 }
  0x2e   :  { %p650_p8 = por %p649_p7, %p648_p6 }
  0x30   :  { %p651_p9 = pnand %p650_p8, %p644_p5 }
  0x32   :  { %654 = shalt.err (!%p651_p9)
}
  0x33   :  { %51 = dma.hbm_to_vmem [thread:$0]  %s867_s3, 1024, %s46_s18, [#allocation7], %s708_s11, %s708_s11, %s709_s12  }
  0x34   :  { %s712_s16 = smov [#allocation9]   ;;  %s655_s21 = scalar_lea.hbm %s869_s5, 1024 }
  0x35   :  { %s59_s17 = sshll.u32 %s712_s16, 4  ;;  %p656_p10 = scmp.ne.s32.totalorder %s869_s5, %s655_s21  ;;  %s60_s17 = int_to_ptr.vmem [resolvable:$true] %s59_s17 }
  0x36   :  { %p659_p11 = scmp.lt.u32.totalorder %s655_s21, %s869_s5 }
  0x38   :  { %p661_p12 = pnand %p659_p11, %p656_p10 }
  0x3a   :  { %664 = shalt.err (!%p661_p12)
}
  0x3b   :  { %s665_s1 = scalar_lea.vmem %s60_s17, 1024  ;;  %p670_p0 = scmp.lt.s32.totalorder %s60_s17, %s60_s17 }
  0x3c   :  { %p666_p13 = scmp.ne.s32.totalorder %s60_s17, %s665_s1  ;;  %p671_p1 = scmp.lt.s32.totalorder %s665_s1, %s665_s1 }
  0x3e   :  { %p672_p2 = por %p671_p1, %p670_p0 }
  0x40   :  { %p673_p3 = pnand %p672_p2, %p666_p13 }
  0x42   :  { %676 = shalt.err (!%p673_p3)
}
  0x43   :  { %65 = dma.hbm_to_vmem [thread:$0]  %s869_s5, 1024, %s60_s17, [#allocation10], %s708_s11, %s708_s11, %s709_s12  }
  0x44   :  { %699 = dma.done.wait [#allocation4], 128  }
  0x45   :  { %700 = vsyncadd [#allocation4], 4294967168 }
  0x46   :  { %701 = dma.done.wait [#allocation7], 2048  }
  0x47   :  { %702 = vsyncadd [#allocation7], 4294965248 }
  0x48   :  { %703 = dma.done.wait [#allocation10], 1024  }
  0x49   :  { %704 = vsyncadd [#allocation10], 4294966272  ;;  %v713_v0 = vmov 0.0   ;;  %vm714_vm0 = vmmov 0   ;;  %v565_v1 = vld [vmem:[#allocation6] sm:$0xff]   ;;  %v566_v2 = vld [vmem:[#allocation6 + $0x8] sm:$0xff]  }
  0x4a   :  { %496 = vmatprep.subr.bf16.mxu0 %v713_v0  ;;  %512 = vmatprep.mubr.msk.bf16.mxu0 %vm714_vm0, %v713_v0  ;;  %v567_v3 = vld [vmem:[#allocation6 + $0x10] sm:$0xff]   ;;  %v573_v4 = vld [vmem:[#allocation8] sm:$0xff]   ;;  %v568_v5 = vld [vmem:[#allocation6 + $0x18] sm:$0xff]   ;;  %s715_s28 = smov [#allocation11]  }
  0x4b   :  { %516 = vmatprep.subr.bf16.mxu1 %v713_v0  ;;  %532 = vmatprep.mubr.msk.bf16.mxu1 %vm714_vm0, %v713_v0  ;;  %v574_v6 = vld [vmem:[#allocation8 + $0x8] sm:$0xff]   ;;  %v569_v7 = vld [vmem:[#allocation6 + $0x20] sm:$0xff]   ;;  %v575_v8 = vld [vmem:[#allocation8 + $0x10] sm:$0xff]   ;;  %s431_s29 = sshll.u32 %s715_s28, 4  ;;  %s432_s29 = int_to_ptr.vmem [resolvable:$true] %s431_s29 }
  0x4c   :  { %497 = vmatpush3.bf16.msra.mxu0 %v565_v1  ;;  %517 = vmatpush3.bf16.msra.mxu1 %v573_v4  ;;  %v570_v9 = vld [vmem:[#allocation6 + $0x28] sm:$0xff]   ;;  %v576_v10 = vld [vmem:[#allocation8 + $0x18] sm:$0xff]   ;;  %v571_v11 = vld [vmem:[#allocation6 + $0x30] sm:$0xff]   ;;  %p682_p5 = scmp.lt.s32.totalorder %s432_s29, %s432_s29 }
  0x4d   :  { %498 = vmatprep.subr.bf16.mxu0 %v713_v0  ;;  %518 = vmatprep.subr.bf16.mxu1 %v713_v0  ;;  %v577_v12 = vld [vmem:[#allocation8 + $0x20] sm:$0xff]   ;;  %v572_v13 = vld [vmem:[#allocation6 + $0x38] sm:$0xff]   ;;  %v578_v15 = vld [vmem:[#allocation8 + $0x28] sm:$0xff]  }
  0x4e   :  { %v81_v14 = vld [vmem:[#allocation3] sm:$0xff]  ;;  %v579_v17 = vld [vmem:[#allocation8 + $0x30] sm:$0xff]   ;;  %v581_v19 = vld [vmem:[#allocation9] sm:$0xff]  }
  0x4f   :  { %v82_v16 = vpack.c.bf16 %v81_v14, %v81_v14  ;;  %v580_v18 = vld [vmem:[#allocation8 + $0x38] sm:$0xff]   ;;  %v582_v20 = vld [vmem:[#allocation9 + $0x8] sm:$0xff]   ;;  %v583_v21 = vld [vmem:[#allocation9 + $0x10] sm:$0xff]  }
  0x50   :  { %499 = vmatpush3.bf16.msra.mxu0 %v566_v2  ;;  %519 = vmatpush3.bf16.msra.mxu1 %v574_v6  ;;  %v584_v22 = vld [vmem:[#allocation9 + $0x18] sm:$0xff]   ;;  %v585_v23 = vld [vmem:[#allocation9 + $0x20] sm:$0xff]   ;;  %v586_v24 = vld [vmem:[#allocation9 + $0x28] sm:$0xff]  }
  0x51   :  { %500 = vmatprep.subr.bf16.mxu0 %v713_v0  ;;  %520 = vmatprep.subr.bf16.mxu1 %v713_v0  ;;  %v442_v25 = vld [vmem:[%s866_s2] ss:$0 sm:$0xff]  ;;  %v587_v33 = vld [vmem:[#allocation9 + $0x30] sm:$0xff]  }
  0x52   :  { %v588_v34 = vld [vmem:[#allocation9 + $0x38] sm:$0xff]  }
  0x53   :  { %v451_v35 = vld [vmem:[%s868_s4] ss:$0 sm:$0xff]  ;;  %s677_s4 = scalar_lea.vmem %s432_s29, 128 }
  0x54   :  { %501 = vmatpush3.bf16.msra.mxu0 %v567_v3  ;;  %521 = vmatpush3.bf16.msra.mxu1 %v575_v8  ;;  %v460_v43 = vld [vmem:[%s870_s6] ss:$0 sm:$0xff]  ;;  %p678_p4 = scmp.ne.s32.totalorder %s432_s29, %s677_s4  ;;  %p683_p6 = scmp.lt.s32.totalorder %s677_s4, %s677_s4 }
  0x55   :  { %502 = vmatprep.subr.bf16.mxu0 %v713_v0  ;;  %522 = vmatprep.subr.bf16.mxu1 %v713_v0 }
  0x56   :  { %p684_p7 = por %p683_p6, %p682_p5 }
  0x58   :  { %503 = vmatpush3.bf16.msra.mxu0 %v568_v5  ;;  %523 = vmatpush3.bf16.msra.mxu1 %v576_v10  ;;  %p685_p8 = pnand %p684_p7, %p678_p4 }
  0x59   :  { %504 = vmatprep.subr.bf16.mxu0 %v713_v0  ;;  %524 = vmatprep.subr.bf16.mxu1 %v713_v0 }
  0x5c   :  { %505 = vmatpush3.bf16.msra.mxu0 %v569_v7  ;;  %525 = vmatpush3.bf16.msra.mxu1 %v577_v12 }
  0x5d   :  { %506 = vmatprep.subr.bf16.mxu0 %v713_v0  ;;  %526 = vmatprep.subr.bf16.mxu1 %v713_v0 }
  0x60   :  { %507 = vmatpush3.bf16.msra.mxu0 %v570_v9  ;;  %527 = vmatpush3.bf16.msra.mxu1 %v578_v15 }
  0x61   :  { %508 = vmatprep.subr.bf16.mxu0 %v713_v0  ;;  %528 = vmatprep.subr.bf16.mxu1 %v713_v0 }
  0x64   :  { %509 = vmatpush3.bf16.msra.mxu0 %v571_v11  ;;  %529 = vmatpush3.bf16.msra.mxu1 %v579_v17 }
  0x65   :  { %510 = vmatprep.subr.bf16.mxu0 %v713_v0  ;;  %530 = vmatprep.subr.bf16.mxu1 %v713_v0 }
  0x68   :  { %511 = vmatpush3.bf16.msra.mxu0 %v572_v13  ;;  %531 = vmatpush3.bf16.msra.mxu1 %v580_v18 }
  0x69   :  { %536 = vmatprep.subr.bf16.mxu0 %v713_v0 }
  0x6b   :  { %513 = vmatmul.mubr.bf16.vlgmr.msra.gmra.mrb[0].mxu0 %v82_v16 }
  0x6c   :  { %552 = vmatprep.mubr.msk.bf16.mxu0 %vm714_vm0, %v713_v0  ;;  %537 = vmatpush3.bf16.msra.mxu0 %v581_v19 }
  0x6d   :  { %538 = vmatprep.subr.bf16.mxu0 %v713_v0 }
  0x70   :  { %539 = vmatpush3.bf16.msra.mxu0 %v582_v20 }
  0x71   :  { %540 = vmatprep.subr.bf16.mxu0 %v713_v0 }
  0x74   :  { %541 = vmatpush3.bf16.msra.mxu0 %v583_v21 }
  0x75   :  { %542 = vmatprep.subr.bf16.mxu0 %v713_v0 }
  0x78   :  { %543 = vmatpush3.bf16.msra.mxu0 %v584_v22 }
  0x79   :  { %544 = vmatprep.subr.bf16.mxu0 %v713_v0 }
  0x7c   :  { %545 = vmatpush3.bf16.msra.mxu0 %v585_v23 }
  0x7d   :  { %546 = vmatprep.subr.bf16.mxu0 %v713_v0 }
  0x80   :  { %547 = vmatpush3.bf16.msra.mxu0 %v586_v24 }
  0x81   :  { %548 = vmatprep.subr.bf16.mxu0 %v713_v0 }
  0x84   :  { %549 = vmatpush3.bf16.msra.mxu0 %v587_v33 }
  0x85   :  { %550 = vmatprep.subr.bf16.mxu0 %v713_v0 }
  0x88   :  { %551 = vmatpush3.bf16.msra.mxu0 %v588_v34 }
 0x13e   :  { %v188_v26 = vpop.f32.mrb[0].mxu0 }
 0x13f   :  { %v189_v27 = vadd.f32 %v442_v25, %v188_v26  ;;  %v514_v28 = vpop.f32.mrb[1].mxu0 }
 0x140   :  { %v191_v29 = vpop.f32.mrb[2].mxu0 }
 0x141   :  { %v194_v30 = vmax.f32 %v189_v27, 0.0  ;;  %v515_v31 = vpop.f32.mrb[3].mxu0 }
 0x143   :  { %v197_v32 = vpack.c.bf16 %v194_v30, %v194_v30 }
 0x145   :  { %533 = vmatmul.mubr.bf16.vlgmr.msra.gmra.mrb[0].mxu1 %v197_v32 }
 0x218   :  { %v303_v36 = vpop.f32.mrb[0].mxu1 }
 0x219   :  { %v304_v37 = vadd.f32 %v451_v35, %v303_v36  ;;  %v534_v38 = vpop.f32.mrb[1].mxu1 }
 0x21a   :  { %v306_v39 = vpop.f32.mrb[2].mxu1 }
 0x21b   :  { %v309_v40 = vmax.f32 %v304_v37, 0.0  ;;  %v535_v41 = vpop.f32.mrb[3].mxu1 }
 0x21d   :  { %v312_v42 = vpack.c.bf16 %v309_v40, %v309_v40 }
 0x21f   :  { %553 = vmatmul.mubr.bf16.vlgmr.msra.gmra.mrb[4].mxu0 %v312_v42 }
 0x2f2   :  { %v418_v44 = vpop.f32.mrb[4].mxu0 }
 0x2f3   :  { %v419_v45 = vadd.f32 %v460_v43, %v418_v44  ;;  %v554_v46 = vpop.f32.mrb[5].mxu0 }
 0x2f4   :  { %v421_v47 = vpop.f32.mrb[6].mxu0 }
 0x2f5   :  { %424 = vst [vmem:[#allocation11] sm:$0xff] %v419_v45  ;;  %v555_v48 = vpop.f32.mrb[7].mxu0 }
 0x2f6   :  { %688 = shalt.err (!%p685_p8)
}
 0x2f7   :  { %s689_s6 = scalar_lea.hbm %s871_s7, 128 }
 0x2f8   :  { %p690_p9 = scmp.ne.s32.totalorder %s871_s7, %s689_s6  ;;  %p693_p10 = scmp.lt.u32.totalorder %s689_s6, %s871_s7 }
 0x2fa   :  { %p695_p11 = pnand %p693_p10, %p690_p9 }
 0x2fc   :  { %698 = shalt.err (!%p695_p11)
}
 0x2fd   :  { %434 = dma.vmem_to_hbm [thread:$0]  %s432_s29, 128, %s871_s7, [#allocation5]  }
 0x2fe   :  { %705 = dma.done.wait [#allocation5], 128  }
 0x2ff   :  { %706 = vsyncadd [#allocation5], 4294967168 }
 0x300   :  { %438 = vsyncpa [#allocation4], 1 }
 0x301   :  { %439 = vsyncpa [#allocation7], 1 }
 0x302   :  { %440 = vsyncpa [#allocation10], 1 }
 0x303   :  { %441 = vsyncpa [#allocation5], 1 }

</bundles_post_ra>
